<compile_context>
chip_gen: v7x
topology: tpu7x:2x2x1
jax: 0.10.0
libtpu: 0.0.40
codegen_flags: <defaults>
</compile_context>

<pallas_src>
import jax
import jax.numpy as jnp
from jax.experimental import pallas as pl
from jax.experimental.pallas import tpu as pltpu


def _front(k):  # rows replicated before the sequence (PyTorch moving_avg)
    return (k - 1) - (k - 1) // 2


def _end(k):    # rows replicated after the sequence
    return (k - 1) // 2


def _vmem_limit_bytes():
    """Generation-aware VMEM budget (v7x: 64 MiB/TC, v5e/v6e: 128 MiB)."""
    try:
        cap = int(pltpu.get_tpu_info().vmem_capacity_bytes)
    except Exception:  # not on a TPU backend / interpret mode / older jax
        cap = 128 * 1024 * 1024
    return int(max(32 * 1024 * 1024, min(96 * 1024 * 1024, (cap * 3) // 4)))


def _pick_lane_tile(n_lanes, n_rows, itemsize, *, min_steps=2,
                    budget_bytes=2 * 1024 * 1024):
    """Largest 128-multiple lane tile dividing n_lanes that fits the per-block
    byte budget, shrunk (down to 128) if it would leave fewer than `min_steps`
    grid steps (keeps both v7x TensorCores fed)."""
    if n_lanes % 128 != 0:
        return n_lanes                       # not lane-dense: single full tile
    cands = [c for c in (2048, 1024, 512, 256, 128) if n_lanes % c == 0]
    fits = [c for c in cands if n_rows * c * itemsize <= budget_bytes]
    t = (fits or cands[-1:])[0]
    while n_lanes // t < min_steps and t > 128 and (t // 2) % 128 == 0:
        t //= 2
    return t


def _make_kernel(kernel_sizes, L):
    K = len(kernel_sizes)
    uniq = sorted(set(kernel_sizes))

    def kernel(w_ref, b_ref, x_ref, res_ref, mean_ref):
        x = x_ref[...].astype(jnp.float32)            # (L, tn)
        tn = x.shape[1]

        def shifted(d):
            # rows r -> x[clip(r + d, 0, L - 1), :] with edge replication,
            # exactly the PyTorch moving_avg front/end padding convention.
            if d == 0:
                return x
            if d < 0:
                a = min(-d, L)
                top = jnp.broadcast_to(x[0:1, :], (a, tn))
                if a >= L:
                    return top
                return jnp.concatenate([top, x[:L - a, :]], axis=0)
            a = min(d, L)
            bot = jnp.broadcast_to(x[L - 1:L, :], (a, tn))
            if a >= L:
                return bot
            return jnp.concatenate([x[a:, :], bot], axis=0)

        # Running max of the K softmax logits (cheap scalar mul-adds).
        m = x * w_ref[0] + b_ref[0]
        for i in range(1, K):
            m = jnp.maximum(m, x * w_ref[i] + b_ref[i])

        num = jnp.zeros_like(x)
        denom = jnp.zeros_like(x)

        # Nested running window sums shared across the sorted kernel sizes
        # (k_max - 1 adds total), fused with the softmax mixture so only
        # x / acc / num / denom / m stay live as full tiles.
        acc = None
        prev_lo = prev_hi = 0
        for k in uniq:
            lo, hi = -_front(k), _end(k)
            if acc is None:
                acc = shifted(lo)
                for d in range(lo + 1, hi + 1):
                    acc = acc + shifted(d)
            else:
                for d in range(lo, prev_lo):
                    acc = acc + shifted(d)
                for d in range(prev_hi + 1, hi + 1):
                    acc = acc + shifted(d)
            prev_lo, prev_hi = lo, hi
            wmean = acc * (1.0 / k)
            for i in range(K):
                if kernel_sizes[i] == k:      # also handles duplicate sizes
                    e = jnp.exp(x * w_ref[i] + b_ref[i] - m)
                    denom = denom + e
                    num = num + e * wmean

        mean = num / denom                    # exact divide (see header note)
        mean_ref[...] = mean.astype(mean_ref.dtype)
        res_ref[...] = (x - mean).astype(res_ref.dtype)

    return kernel


def series_decomp_multi(x, w, b, kernel_sizes):
    """Forward of FEDformer series_decomp_multi.

    x: (B, L, C) float.  w: (K, 1), b: (K,) -- the nn.Linear(1, K) params.
    Returns (res, moving_mean), both (B, L, C).
    """
    B, L, C = x.shape
    K = len(kernel_sizes)
    w_vec = jnp.reshape(w, (K,)).astype(jnp.float32)
    b_vec = jnp.reshape(b, (K,)).astype(jnp.float32)
    itemsize = jnp.dtype(x.dtype).itemsize
    vmem_limit = _vmem_limit_bytes()
    kernel = _make_kernel(tuple(int(k) for k in kernel_sizes), L)
    smem = pl.BlockSpec(memory_space=pltpu.MemorySpace.SMEM)

    # TODO(synk): extremely long sequences (L * 128 lanes * itemsize beyond the
    # VMEM budget) would need row tiling plus an in-kernel halo DMA; FEDformer
    # sequence lengths (<= ~1k) fit comfortably in a single row block.

    if C % 128 == 0:
        # Lane-dense fast path: no transposes; L on sublanes, C on lanes.
        tc = _pick_lane_tile(C, L, itemsize, min_steps=1 if B > 1 else 2)
        spec = pl.BlockSpec((None, L, tc), lambda bi, ci: (bi, 0, ci))
        res, mean = pl.pallas_call(
            kernel,
            out_shape=(jax.ShapeDtypeStruct((B, L, C), x.dtype),) * 2,
            grid=(B, C // tc),
            in_specs=[smem, smem, spec],
            out_specs=(spec, spec),
            compiler_params=pltpu.CompilerParams(
                dimension_semantics=("parallel", "parallel"),
                vmem_limit_bytes=vmem_limit),
        )(w_vec, b_vec, x)
        return res, mean

    # General path: fold (B, L, C) -> (L, B*C) so lanes are as dense as
    # possible; the moving average runs along L (sublanes).
    N = B * C
    xT = jnp.transpose(x, (1, 0, 2)).reshape(L, N)
    tn = _pick_lane_tile(N, L, itemsize, min_steps=2)
    spec = pl.BlockSpec((L, tn), lambda j: (0, j))
    res_f, mean_f = pl.pallas_call(
        kernel,
        out_shape=(jax.ShapeDtypeStruct((L, N), x.dtype),) * 2,
        grid=(N // tn,),
        in_specs=[smem, smem, spec],
        out_specs=(spec, spec),
        compiler_params=pltpu.CompilerParams(
            dimension_semantics=("parallel",),
            vmem_limit_bytes=vmem_limit),
    )(w_vec, b_vec, xT)

    def unfold(y):
        return jnp.transpose(y.reshape(L, B, C), (1, 0, 2))

    return unfold(res_f), unfold(mean_f)


def _reference(x, w, b, kernel_sizes):
    # Pure-JAX mirror of the PyTorch forward.
    B, L, C = x.shape
    K = len(kernel_sizes)
    t = jnp.arange(L)
    mas = []
    for k in kernel_sizes:
        idx = jnp.clip(t[:, None] + jnp.arange(k)[None, :] - _front(k), 0, L - 1)
        mas.append(jnp.mean(x[:, idx, :], axis=2))             # (B, L, C)
    ma = jnp.stack(mas, axis=-1)                               # (B, L, C, K)
    logits = (x[..., None] * jnp.reshape(w, (1, 1, 1, K))
              + jnp.reshape(b, (1, 1, 1, K)))
    p = jax.nn.softmax(logits, axis=-1)
    mean = jnp.sum(ma * p, axis=-1)
    return x - mean, mean


def _check(x, w, b, kernel_sizes):
    res, mean = series_decomp_multi(x, w, b, kernel_sizes)
    jax.block_until_ready((res, mean))
    res_ref, mean_ref = _reference(x, w, b, kernel_sizes)
    assert res.shape == x.shape and mean.shape == x.shape
    assert jnp.allclose(mean, mean_ref, atol=1e-4, rtol=1e-4), "mean mismatch"
    assert jnp.allclose(res, res_ref, atol=1e-4, rtol=1e-4), "res mismatch"


if __name__ == "__main__":
    key = jax.random.PRNGKey(0)
    k1, k2 = jax.random.split(key)

    # General (lane-folded) path: small, non-lane-dense C.
    B, L, C = 2, 32, 8
    ks = [3, 5]
    Kn = len(ks)
    x = jax.random.normal(k1, (B, L, C), dtype=jnp.float32)
    w = (jnp.arange(1, Kn + 1, dtype=jnp.float32) * 0.1).reshape(Kn, 1)
    b = jnp.arange(Kn, dtype=jnp.float32) * 0.05 - 0.1
    _check(x, w, b, ks)

    # Lane-dense fast path (C % 128 == 0): runs directly on (B, L, C).
    B2, L2, C2 = 2, 16, 128
    ks2 = [5, 9]
    K2 = len(ks2)
    x2 = jax.random.normal(k2, (B2, L2, C2), dtype=jnp.float32)
    w2 = (jnp.arange(1, K2 + 1, dtype=jnp.float32) * -0.07).reshape(K2, 1)
    b2 = jnp.arange(K2, dtype=jnp.float32) * 0.03 + 0.02
    _check(x2, w2, b2, ks2)

    print("KERNEL_OK")
</pallas_src>

<mosaic_0001>
module attributes {stable_mosaic.version = 11 : i64} {
  func.func @kernel(%arg0: i32, %arg1: memref<2xf32, #tpu.memory_space<smem>>, %arg2: memref<2xf32, #tpu.memory_space<smem>>, %arg3: memref<32x16xf32, #tpu.memory_space<vmem>>, %arg4: memref<32x16xf32, #tpu.memory_space<vmem>>, %arg5: memref<32x16xf32, #tpu.memory_space<vmem>>) attributes {dimension_semantics = [#tpu.dimension_semantics<parallel>], iteration_bounds = array<i64: 1>, scalar_prefetch = 0 : i64, scratch_operands = 0 : i64, tpu.core_type = #tpu.core_type<tc>, window_params = [{transform_indices = @transform_0, window_bounds = array<i64: 2>}, {transform_indices = @transform_1, window_bounds = array<i64: 2>}, {transform_indices = @transform_2, window_bounds = array<i64: 32, 16>}, {transform_indices = @transform_3, window_bounds = array<i64: 32, 16>}, {transform_indices = @transform_4, window_bounds = array<i64: 32, 16>}]} {
    %c0 = arith.constant 0 : index
    %c0_0 = arith.constant 0 : index
    %0 = vector.load %arg3[%c0, %c0_0] : memref<32x16xf32, #tpu.memory_space<vmem>>, vector<32x16xf32>
    %c0_1 = arith.constant 0 : index
    %1 = memref.load %arg1[%c0_1] : memref<2xf32, #tpu.memory_space<smem>>
    %2 = vector.broadcast %1 : f32 to vector<32x16xf32>
    %3 = arith.mulf %0, %2 : vector<32x16xf32>
    %c0_2 = arith.constant 0 : index
    %4 = memref.load %arg2[%c0_2] : memref<2xf32, #tpu.memory_space<smem>>
    %5 = vector.broadcast %4 : f32 to vector<32x16xf32>
    %6 = arith.addf %3, %5 : vector<32x16xf32>
    %c1 = arith.constant 1 : index
    %7 = memref.load %arg1[%c1] : memref<2xf32, #tpu.memory_space<smem>>
    %8 = vector.broadcast %7 : f32 to vector<32x16xf32>
    %9 = arith.mulf %0, %8 : vector<32x16xf32>
    %c1_3 = arith.constant 1 : index
    %10 = memref.load %arg2[%c1_3] : memref<2xf32, #tpu.memory_space<smem>>
    %11 = vector.broadcast %10 : f32 to vector<32x16xf32>
    %12 = arith.addf %9, %11 : vector<32x16xf32>
    %13 = arith.maximumf %6, %12 : vector<32x16xf32>
    %cst = arith.constant 0.000000e+00 : f32
    %14 = vector.broadcast %cst : f32 to vector<32x16xf32>
    %cst_4 = arith.constant 0.000000e+00 : f32
    %15 = vector.broadcast %cst_4 : f32 to vector<32x16xf32>
    %16 = vector.extract_strided_slice %0 {offsets = [0, 0], sizes = [1, 16], strides = [1, 1]} : vector<32x16xf32> to vector<1x16xf32>
    %17 = vector.extract_strided_slice %0 {offsets = [0, 0], sizes = [31, 16], strides = [1, 1]} : vector<32x16xf32> to vector<31x16xf32>
    %18 = tpu.concatenate %16, %17 in 0 : vector<1x16xf32>, vector<31x16xf32> -> vector<32x16xf32>
    %19 = arith.addf %18, %0 : vector<32x16xf32>
    %20 = vector.extract_strided_slice %0 {offsets = [31, 0], sizes = [1, 16], strides = [1, 1]} : vector<32x16xf32> to vector<1x16xf32>
    %21 = vector.extract_strided_slice %0 {offsets = [1, 0], sizes = [31, 16], strides = [1, 1]} : vector<32x16xf32> to vector<31x16xf32>
    %22 = tpu.concatenate %21, %20 in 0 : vector<31x16xf32>, vector<1x16xf32> -> vector<32x16xf32>
    %23 = arith.addf %19, %22 : vector<32x16xf32>
    %cst_5 = arith.constant 0.333333343 : f32
    %24 = vector.broadcast %cst_5 : f32 to vector<32x16xf32>
    %25 = arith.mulf %23, %24 : vector<32x16xf32>
    %c0_6 = arith.constant 0 : index
    %26 = memref.load %arg1[%c0_6] : memref<2xf32, #tpu.memory_space<smem>>
    %27 = vector.broadcast %26 : f32 to vector<32x16xf32>
    %28 = arith.mulf %0, %27 : vector<32x16xf32>
    %c0_7 = arith.constant 0 : index
    %29 = memref.load %arg2[%c0_7] : memref<2xf32, #tpu.memory_space<smem>>
    %30 = vector.broadcast %29 : f32 to vector<32x16xf32>
    %31 = arith.addf %28, %30 : vector<32x16xf32>
    %32 = arith.subf %31, %13 : vector<32x16xf32>
    %33 = math.exp %32 : vector<32x16xf32>
    %34 = arith.addf %15, %33 : vector<32x16xf32>
    %35 = arith.mulf %33, %25 : vector<32x16xf32>
    %36 = arith.addf %14, %35 : vector<32x16xf32>
    %37 = vector.extract_strided_slice %0 {offsets = [0, 0], sizes = [1, 16], strides = [1, 1]} : vector<32x16xf32> to vector<1x16xf32>
    %38 = vector.shape_cast %37 : vector<1x16xf32> to vector<1x16xf32>
    %39 = vector.broadcast %38 : vector<1x16xf32> to vector<2x16xf32>
    %40 = vector.extract_strided_slice %0 {offsets = [0, 0], sizes = [30, 16], strides = [1, 1]} : vector<32x16xf32> to vector<30x16xf32>
    %41 = tpu.concatenate %39, %40 in 0 : vector<2x16xf32>, vector<30x16xf32> -> vector<32x16xf32>
    %42 = arith.addf %23, %41 : vector<32x16xf32>
    %43 = vector.extract_strided_slice %0 {offsets = [31, 0], sizes = [1, 16], strides = [1, 1]} : vector<32x16xf32> to vector<1x16xf32>
    %44 = vector.shape_cast %43 : vector<1x16xf32> to vector<1x16xf32>
    %45 = vector.broadcast %44 : vector<1x16xf32> to vector<2x16xf32>
    %46 = vector.extract_strided_slice %0 {offsets = [2, 0], sizes = [30, 16], strides = [1, 1]} : vector<32x16xf32> to vector<30x16xf32>
    %47 = tpu.concatenate %46, %45 in 0 : vector<30x16xf32>, vector<2x16xf32> -> vector<32x16xf32>
    %48 = arith.addf %42, %47 : vector<32x16xf32>
    %cst_8 = arith.constant 2.000000e-01 : f32
    %49 = vector.broadcast %cst_8 : f32 to vector<32x16xf32>
    %50 = arith.mulf %48, %49 : vector<32x16xf32>
    %c1_9 = arith.constant 1 : index
    %51 = memref.load %arg1[%c1_9] : memref<2xf32, #tpu.memory_space<smem>>
    %52 = vector.broadcast %51 : f32 to vector<32x16xf32>
    %53 = arith.mulf %0, %52 : vector<32x16xf32>
    %c1_10 = arith.constant 1 : index
    %54 = memref.load %arg2[%c1_10] : memref<2xf32, #tpu.memory_space<smem>>
    %55 = vector.broadcast %54 : f32 to vector<32x16xf32>
    %56 = arith.addf %53, %55 : vector<32x16xf32>
    %57 = arith.subf %56, %13 : vector<32x16xf32>
    %58 = math.exp %57 : vector<32x16xf32>
    %59 = arith.addf %34, %58 : vector<32x16xf32>
    %60 = arith.mulf %58, %50 : vector<32x16xf32>
    %61 = arith.addf %36, %60 : vector<32x16xf32>
    %62 = arith.divf %61, %59 : vector<32x16xf32>
    %c0_11 = arith.constant 0 : index
    %c0_12 = arith.constant 0 : index
    %63 = vector.load %arg5[%c0_11, %c0_12] : memref<32x16xf32, #tpu.memory_space<vmem>>, vector<32x16xf32>
    tpu.vector_store %arg5[%c0_11, %c0_12], %62 {strides = array<i32>} : memref<32x16xf32, #tpu.memory_space<vmem>>, vector<32x16xf32>,
    %64 = arith.subf %0, %62 : vector<32x16xf32>
    %c0_13 = arith.constant 0 : index
    %c0_14 = arith.constant 0 : index
    %65 = vector.load %arg4[%c0_13, %c0_14] : memref<32x16xf32, #tpu.memory_space<vmem>>, vector<32x16xf32>
    tpu.vector_store %arg4[%c0_13, %c0_14], %64 {strides = array<i32>} : memref<32x16xf32, #tpu.memory_space<vmem>>, vector<32x16xf32>,
    return
  }
  func.func @transform_0(%arg0: i32) -> i32 {
    %c0_i32 = arith.constant 0 : i32
    %c0_i32_0 = arith.constant 0 : i32
    return %c0_i32 : i32
  }
  func.func @transform_1(%arg0: i32) -> i32 {
    %c0_i32 = arith.constant 0 : i32
    %c0_i32_0 = arith.constant 0 : i32
    return %c0_i32 : i32
  }
  func.func @transform_2(%arg0: i32) -> (i32, i32) {
    %c0_i32 = arith.constant 0 : i32
    %c0_i32_0 = arith.constant 0 : i32
    return %c0_i32, %arg0 : i32, i32
  }
  func.func @transform_3(%arg0: i32) -> (i32, i32) {
    %c0_i32 = arith.constant 0 : i32
    %c0_i32_0 = arith.constant 0 : i32
    return %c0_i32, %arg0 : i32, i32
  }
  func.func @transform_4(%arg0: i32) -> (i32, i32) {
    %c0_i32 = arith.constant 0 : i32
    %c0_i32_0 = arith.constant 0 : i32
    return %c0_i32, %arg0 : i32, i32
  }
}

</mosaic_0001>

<bundles_post_ra>
// kernel: tpu_custom_call.1
= control target key start
LH: loop header
LB: loop body
LE: loop exit
PB: predicated region body
PF: predicated region fallthrough
CT: control target
= control target key end

     0   :  { %10 = vsyncpa [#allocation5], 0  ;;  %s598_s0 = inlined_call_operand.hbm [shape: f32[2], index: 0, kind: input, shape index: {}]   ;;  %s599_s1 = inlined_call_operand.hbm [shape: f32[2], index: 1, kind: input, shape index: {}]   ;;  %s600_s2 = inlined_call_operand.hbm [shape: f32[32,16], index: 2, kind: input, shape index: {}]   ;;  %s601_s3 = inlined_call_operand.hbm [shape: f32[32,16], index: 3, kind: output, shape index: {0}]   ;;  %s602_s4 = inlined_call_operand.hbm [shape: f32[32,16], index: 4, kind: output, shape index: {1}]  }
   0x1   :  { %11 = vsyncpa [#allocation7], 0 }
   0x2   :  { %12 = vsyncpa [#allocation3], 0 }
   0x3   :  { %13 = vsyncpa [#allocation4], 0 }
   0x4   :  { %14 = vsyncpa [#allocation11], 0  ;;  %s310_s17 = scalar_lea.hbm %s598_s0, 16 }
   0x5   :  { %p311_p0 = scmp.ne.s32.totalorder %s598_s0, %s310_s17  ;;  %p314_p1 = scmp.lt.u32.totalorder %s310_s17, %s598_s0 }
   0x7   :  { %p316_p2 = pnand %p314_p1, %p311_p0 }
   0x9   :  { %319 = shalt.err (!%p316_p2)
}
   0xa   :  { %s406_s22 = smov [#allocation2]   ;;  %s320_s27 = scalar_lea.hbm %s599_s1, 16 }
   0xb   :  { %22 = dma.hbm_to_smem %s598_s0, 16, %s406_s22, [#allocation5]  }
   0xc   :  { %p321_p3 = scmp.ne.s32.totalorder %s599_s1, %s320_s27  ;;  %p324_p4 = scmp.lt.u32.totalorder %s320_s27, %s599_s1 }
   0xe   :  { %p326_p5 = pnand %p324_p4, %p321_p3 }
  0x10   :  { %329 = shalt.err (!%p326_p5)
}
  0x11   :  { %s407_s6 = smov [#allocation6]   ;;  %s408_s0 = smov [#allocation8]  }
  0x12   :  { %30 = dma.hbm_to_smem %s599_s1, 16, %s407_s6, [#allocation7]  }
  0x13   :  { %s36_s9 = sshll.u32 %s408_s0, 4  ;;  %s330_s12 = scalar_lea.hbm %s600_s2, 512  ;;  %s37_s9 = int_to_ptr.vmem [resolvable:$true] %s36_s9 }
  0x14   :  { %p331_p6 = scmp.ne.s32.totalorder %s600_s2, %s330_s12  ;;  %p334_p7 = scmp.lt.u32.totalorder %s330_s12, %s600_s2 }
  0x16   :  { %p336_p8 = pnand %p334_p7, %p331_p6 }
  0x18   :  { %339 = shalt.err (!%p336_p8)
}
  0x19   :  { %s340_s17 = scalar_lea.vmem %s37_s9, 512  ;;  %p345_p10 = scmp.lt.s32.totalorder %s37_s9, %s37_s9 }
  0x1a   :  { %p341_p9 = scmp.ne.s32.totalorder %s37_s9, %s340_s17  ;;  %p346_p11 = scmp.lt.s32.totalorder %s340_s17, %s340_s17 }
  0x1c   :  { %p347_p12 = por %p346_p11, %p345_p10 }
  0x1e   :  { %p348_p13 = pnand %p347_p12, %p341_p9 }
  0x20   :  { %351 = shalt.err (!%p348_p13)
}
  0x21   :  { %s409_s1 = smov 128   ;;  %s410_s18 = smov 8  }
  0x22   :  { %42 = dma.hbm_to_vmem [thread:$0]  %s600_s2, 512, %s37_s9, [#allocation3], %s409_s1, %s409_s1, %s410_s18  }
  0x23   :  { %396 = dma.done.wait [#allocation5], 16  }
  0x24   :  { %397 = vsyncadd [#allocation5], 4294967280 }
  0x25   :  { %398 = dma.done.wait [#allocation7], 16  }
  0x26   :  { %399 = vsyncadd [#allocation7], 4294967280 }
  0x27   :  { %400 = dma.done.wait [#allocation3], 512  }
  0x28   :  { %401 = vsyncadd [#allocation3], 4294966784 }
  0x29   :  { %52 = sfence }
  0x2a   :  { %v477_v0 = vld [vmem:[#allocation8] sm:$0xff]  ;;  %s57_s21 = sld [smem:[#allocation2]]  ;;  %v151_v1 = vlaneseq  ;;  %s277_s23 = sld [smem:[#allocation2 + $0x1]]  ;;  %vm89_vm0 = vcmask 1040384   ;;  %v482_v4 = vld [vmem:[#allocation8 + $0x8] sm:$0xff]  ;;  %vm106_vm1 = vcmask 1046528  }
  0x2b   :  { %s63_s22 = sld [smem:[#allocation6]]  ;;  %s278_s24 = sld [smem:[#allocation6 + $0x1]]  ;;  %v90_v2 = vrot.slane %v477_v0, 7  ;;  %v107_v5 = vrot.slane %v477_v0, 1  ;;  %v108_v6 = vrot.slane %v482_v4, 1  ;;  %v156_v14 = vrot.slane %v477_v0, 6 }
  0x2c   :  { %v480_v3 = vshrl.u32 %v151_v1, 7  ;;  %v177_v20 = vrot.slane %v477_v0, 2  ;;  %v501_v21 = vld [vmem:[#allocation8 + $0x10] sm:$0xff]  ;;  %v91_v23 = vrot.slane %v482_v4, 7  ;;  %v178_v26 = vrot.slane %v482_v4, 2  ;;  %v519_v47 = vld [vmem:[#allocation8 + $0x18] sm:$0xff] }
  0x2d   :  { %v101_v7 = vsel %vm89_vm0, %v477_v0, %v90_v2  ;;  %v109_v17 = vsel %vm106_vm1, %v107_v5, %v108_v6  ;;  %vm155_vm2 = vcmask 1041408   ;;  %vm176_vm3 = vcmask 1045504   ;;  %s411_s2 = smov [#allocation10]   ;;  %s412_s26 = smov [#allocation9]  }
  0x2e   :  { %v153_v10 = vsub.s32 0, %v480_v3  ;;  %v102_v16 = vadd.f32 %v101_v7, %v477_v0  ;;  %v92_v34 = vsel %vm89_vm0, %v90_v2, %v91_v23  ;;  %v110_v35 = vrot.slane %v501_v21, 1  ;;  %s259_s25 = sshll.u32 %s411_s2, 4  ;;  %s247_s27 = sshll.u32 %s412_s26, 4  ;;  %s260_s25 = int_to_ptr.vmem [resolvable:$true] %s259_s25  ;;  %s560_s27 = int_to_ptr.vmem [resolvable:$true] %s247_s27 }
  0x2f   :  { %v179_v38 = vsel %vm176_vm3, %v177_v20, %v178_v26  ;;  %v103_v46 = vadd.f32 %v92_v34, %v482_v4  ;;  %v93_v48 = vrot.slane %v501_v21, 7  ;;  %v112_v52 = vrot.slane %v519_v47, 1  ;;  %s352_s28 = scalar_lea.vmem %s260_s25, 512  ;;  %p357_p1 = scmp.lt.s32.totalorder %s260_s25, %s260_s25 }
  0x30   :  { %v58_v8 = vstv %s57_s21  ;;  %v70_v12 = vstv %s277_s23  ;;  %v154_v25 = vrot.slane %v477_v0, %v153_v10  ;;  %v119_v32 = vadd.f32 %v109_v17, %v102_v16  ;;  %p353_p0 = scmp.ne.s32.totalorder %s260_s25, %s352_s28  ;;  %p358_p2 = scmp.lt.s32.totalorder %s352_s28, %s352_s28 }
  0x31   :  { %v488_v9 = vstv %s63_s22  ;;  %v59_v11 = vmul.f32 %v58_v8, %v477_v0  ;;  %v492_v13 = vstv %s278_s24  ;;  %v71_v15 = vmul.f32 %v70_v12, %v477_v0 }
  0x32   :  { %v60_v18 = vmul.f32 %v58_v8, %v482_v4  ;;  %v72_v22 = vmul.f32 %v70_v12, %v482_v4  ;;  %v61_v30 = vmul.f32 %v58_v8, %v501_v21  ;;  %v73_v31 = vmul.f32 %v70_v12, %v501_v21  ;;  %p359_p3 = por %p358_p2, %p357_p1 }
  0x33   :  { %v65_v19 = vadd.f32 %v488_v9, %v59_v11  ;;  %v77_v24 = vadd.f32 %v492_v13, %v71_v15  ;;  %v167_v37 = vsel %vm155_vm2, %v154_v25, %v156_v14  ;;  %v111_v53 = vsel %vm106_vm1, %v108_v6, %v110_v35 }
  0x34   :  { %v66_v27 = vadd.f32 %v488_v9, %v60_v18  ;;  %v78_v28 = vadd.f32 %v492_v13, %v72_v22  ;;  %v67_v42 = vadd.f32 %v488_v9, %v61_v30  ;;  %v79_v43 = vadd.f32 %v492_v13, %v73_v31  ;;  %p360_p4 = pnand %p359_p3, %p353_p0 }
  0x35   :  { %v81_v29 = vmax.f32 %v65_v19, %v77_v24  ;;  %v157_v54 = vrot.slane %v482_v4, 6  ;;  %v94_v55 = vsel %vm89_vm0, %v91_v23, %v93_v48  ;;  %v168_v56 = vadd.f32 %v167_v37, %v119_v32 }
  0x36   :  { %v82_v33 = vmax.f32 %v66_v27, %v78_v28  ;;  %v83_v51 = vmax.f32 %v67_v42, %v79_v43  ;;  %v104_v57 = vadd.f32 %v94_v55, %v501_v21  ;;  %v113_v59 = vsel %vm106_vm1, %v110_v35, %v112_v52 }
  0x37   :  { %v127_v36 = vsub.f32 %v65_v19, %v81_v29  ;;  %v197_v39 = vsub.f32 %v77_v24, %v81_v29  ;;  %v159_v60 = vrot.slane %v501_v21, 6  ;;  %v120_v62 = vadd.f32 %v111_v53, %v103_v46 }
  0x38   :  { %v128_v40 = vsub.f32 %v66_v27, %v82_v33  ;;  %v198_v41 = vsub.f32 %v78_v28, %v82_v33  ;;  %v129_v58 = vsub.f32 %v67_v42, %v83_v51  ;;  %v199_v61 = vsub.f32 %v79_v43, %v83_v51 }
  0x39   :  { %v131_v44 = vmul.f32 1.442695, %v127_v36  ;;  %v201_v45 = vmul.f32 1.442695, %v197_v39  ;;  %v62_v1 = vmul.f32 %v58_v8, %v519_v47  ;;  %v158_v2 = vsel %vm155_vm2, %v156_v14, %v157_v54 }
  0x3a   :  { %v133_v49 = vmul.f32 1.442695, %v128_v40  ;;  %v203_v50 = vmul.f32 1.442695, %v198_v41  ;;  %v135_v63 = vmul.f32 1.442695, %v129_v58  ;;  %v74_v7 = vmul.f32 %v70_v12, %v519_v47 }
  0x3b   :  { %286 = vpow2.f32 %v131_v44  ;;  %v180_v5 = vrot.slane %v501_v21, 2  ;;  %v205_v6 = vmul.f32 1.442695, %v199_v61  ;;  %v121_v10 = vadd.f32 %v113_v59, %v104_v57 }
  0x3c   :  { %288 = vpow2.f32 %v201_v45  ;;  %v68_v11 = vadd.f32 %v488_v9, %v62_v1  ;;  %v95_v15 = vrot.slane %v519_v47, 7  ;;  %v160_v16 = vsel %vm155_vm2, %v157_v54, %v159_v60 }
  0x3d   :  { %290 = vpow2.f32 %v133_v49  ;;  %v182_v17 = vrot.slane %v519_v47, 2  ;;  %v80_v8 = vadd.f32 %v492_v13, %v74_v7  ;;  %v169_v18 = vadd.f32 %v158_v2, %v120_v62 }
  0x3e   :  { %292 = vpow2.f32 %v203_v50  ;;  %v181_v14 = vsel %vm176_vm3, %v178_v26, %v180_v5  ;;  %v189_v20 = vadd.f32 %v179_v38, %v168_v56  ;;  %v170_v22 = vadd.f32 %v160_v16, %v121_v10 }
  0x3f   :  { %294 = vpow2.f32 %v135_v63  ;;  %v84_v19 = vmax.f32 %v68_v11, %v80_v8  ;;  %v96_v12 = vsel %vm89_vm0, %v93_v48, %v95_v15  ;;  %v183_v9 = vsel %vm176_vm3, %v180_v5, %v182_v17 }
  0x40   :  { %296 = vpow2.f32 %v205_v6  ;;  %v190_v28 = vadd.f32 %v181_v14, %v169_v18  ;;  %v123_v30 = vmul.f32 0.33333334, %v119_v32  ;;  %v105_v13 = vadd.f32 %v96_v12, %v519_v47 }
  0x41   :  { %v130_v24 = vsub.f32 %v68_v11, %v84_v19  ;;  %v200_v25 = vsub.f32 %v80_v8, %v84_v19  ;;  %v193_v26 = vmul.f32 0.2, %v189_v20  ;;  %v191_v35 = vadd.f32 %v183_v9, %v170_v22 }
  0x42   :  { %v118_v36 = vsel %vm106_vm1, %v112_v52, %v519_v47  ;;  %v161_v39 = vrot.slane %v519_v47, 6  ;;  %v174_v40 = vsub.s32 7, %v480_v3  ;;  %v124_v42 = vmul.f32 0.33333334, %v120_v62 }
  0x43   :  { %v137_v33 = vmul.f32 1.442695, %v130_v24  ;;  %v207_v37 = vmul.f32 1.442695, %v200_v25  ;;  %v194_v32 = vmul.f32 0.2, %v190_v28  ;;  %v122_v44 = vadd.f32 %v118_v36, %v105_v13 }
  0x44   :  { %v125_v49 = vmul.f32 0.33333334, %v121_v10  ;;  %v195_v50 = vmul.f32 0.2, %v191_v35  ;;  %v162_v51 = vsel %vm155_vm2, %v159_v60, %v161_v39  ;;  %v175_v52 = vrot.slane %v519_v47, %v174_v40 }
  0x45   :  { %v287_v23 = vpop.eup %286  ;;  %v171_v55 = vadd.f32 %v162_v51, %v122_v44  ;;  %vm229_vm4 = vcmask 130048   ;;  %v126_v15 = vmul.f32 0.33333334, %v122_v44 }
  0x46   :  { %v289_v27 = vpop.eup %288  ;;  %v143_v45 = vmul.f32 %v287_v23, %v123_v30  ;;  %v188_v58 = vsel %vm176_vm3, %v182_v17, %v175_v52 }
  0x47   :  { %v291_v29 = vpop.eup %290  ;;  %v209_v31 = vadd.f32 %v289_v27, %v287_v23  ;;  %v213_v46 = vmul.f32 %v289_v27, %v193_v26  ;;  %v192_v1 = vadd.f32 %v188_v58, %v171_v55 }
  0x48   :  { %v293_v34 = vpop.eup %292  ;;  %v144_v53 = vmul.f32 %v291_v29, %v124_v42 }
  0x49   :  { %298 = vrcp.f32 %v209_v31  ;;  %v210_v38 = vadd.f32 %v293_v34, %v291_v29  ;;  %v295_v41 = vpop.eup %294  ;;  %v214_v54 = vmul.f32 %v293_v34, %v194_v32  ;;  %v217_v3 = vadd.f32 %v213_v46, %v143_v45 }
  0x4a   :  { %300 = vpow2.f32 %v137_v33  ;;  %v297_v43 = vpop.eup %296  ;;  %v145_v56 = vmul.f32 %v295_v41, %v125_v49  ;;  %v196_v16 = vmul.f32 0.2, %v192_v1 }
  0x4b   :  { %302 = vrcp.f32 %v210_v38  ;;  %v211_v48 = vadd.f32 %v297_v43, %v295_v41  ;;  %v215_v57 = vmul.f32 %v297_v43, %v195_v50  ;;  %v218_v59 = vadd.f32 %v214_v54, %v144_v53 }
  0x4c   :  { %304 = vpow2.f32 %v207_v37 }
  0x4d   :  { %306 = vrcp.f32 %v211_v48  ;;  %v219_v5 = vadd.f32 %v215_v57, %v145_v56 }
  0x53   :  { %v299_v61 = vpop.eup %298 }
  0x54   :  { %v301_v62 = vpop.eup %300  ;;  %v222_v63 = vmul.f32 %v299_v61, %v217_v3 }
  0x55   :  { %v303_v2 = vpop.eup %302  ;;  %v146_v14 = vmul.f32 %v301_v62, %v126_v15 }
  0x56   :  { %v305_v60 = vpop.eup %304  ;;  %230 = vst.msk [vmem:[#allocation10] sm:$0xff] %vm229_vm4, %v222_v63  ;;  %v224_v6 = vmul.f32 %v303_v2, %v218_v59  ;;  %v234_v7 = vsub.f32 %v477_v0, %v222_v63 }
  0x57   :  { %v212_v10 = vadd.f32 %v305_v60, %v301_v62  ;;  %v307_v11 = vpop.eup %306  ;;  %v216_v0 = vmul.f32 %v305_v60, %v196_v16 }
  0x58   :  { %231 = vst.msk [vmem:[#allocation10 + $0x8] sm:$0xff] %vm229_vm4, %v224_v6  ;;  %238 = vst.msk [vmem:[#allocation9] sm:$0xff] %vm229_vm4, %v234_v7  ;;  %v235_v17 = vsub.f32 %v482_v4, %v224_v6  ;;  %v226_v8 = vmul.f32 %v307_v11, %v219_v5 }
  0x59   :  { %308 = vrcp.f32 %v212_v10  ;;  %v220_v19 = vadd.f32 %v216_v0, %v146_v14 }
  0x5a   :  { %239 = vst.msk [vmem:[#allocation9 + $0x8] sm:$0xff] %vm229_vm4, %v235_v17  ;;  %232 = vst.msk [vmem:[#allocation10 + $0x10] sm:$0xff] %vm229_vm4, %v226_v8  ;;  %v236_v18 = vsub.f32 %v501_v21, %v226_v8 }
  0x5c   :  { %240 = vst.msk [vmem:[#allocation9 + $0x10] sm:$0xff] %vm229_vm4, %v236_v18 }
  0x63   :  { %v309_v20 = vpop.eup %308 }
  0x64   :  { %v228_v22 = vmul.f32 %v309_v20, %v220_v19 }
  0x66   :  { %233 = vst.msk [vmem:[#allocation10 + $0x18] sm:$0xff] %vm229_vm4, %v228_v22  ;;  %v237_v4 = vsub.f32 %v519_v47, %v228_v22 }
  0x67   :  { %363 = shalt.err (!%p360_p4)
}
  0x68   :  { %s364_s5 = scalar_lea.hbm %s602_s4, 512 }
  0x69   :  { %p365_p5 = scmp.ne.s32.totalorder %s602_s4, %s364_s5  ;;  %p368_p6 = scmp.lt.u32.totalorder %s364_s5, %s602_s4 }
  0x6b   :  { %p370_p7 = pnand %p368_p6, %p365_p5 }
  0x6d   :  { %373 = shalt.err (!%p370_p7)
}
  0x6e   :  { %265 = dma.vmem_to_hbm [thread:$0]  %s260_s25, 512, %s602_s4, [#allocation11], %s409_s1, %s409_s1, %s410_s18   ;;  %241 = vst.msk [vmem:[#allocation9 + $0x18] sm:$0xff] %vm229_vm4, %v237_v4 }
  0x6f   :  { %s374_s11 = scalar_lea.vmem %s560_s27, 512  ;;  %p379_p9 = scmp.lt.s32.totalorder %s560_s27, %s560_s27 }
  0x70   :  { %p375_p8 = scmp.ne.s32.totalorder %s560_s27, %s374_s11  ;;  %p380_p10 = scmp.lt.s32.totalorder %s374_s11, %s374_s11 }
  0x72   :  { %p381_p11 = por %p380_p10, %p379_p9 }
  0x74   :  { %p382_p12 = pnand %p381_p11, %p375_p8 }
  0x76   :  { %385 = shalt.err (!%p382_p12)
}
  0x77   :  { %s386_s14 = scalar_lea.hbm %s601_s3, 512 }
  0x78   :  { %p387_p13 = scmp.ne.s32.totalorder %s601_s3, %s386_s14  ;;  %p390_p0 = scmp.lt.u32.totalorder %s386_s14, %s601_s3 }
  0x7a   :  { %p392_p1 = pnand %p390_p0, %p387_p13 }
  0x7c   :  { %395 = shalt.err (!%p392_p1)
}
  0x7d   :  { %253 = dma.vmem_to_hbm [thread:$0]  %s560_s27, 512, %s601_s3, [#allocation4], %s409_s1, %s409_s1, %s410_s18  }
  0x7e   :  { %402 = dma.done.wait [#allocation4], 512  }
  0x7f   :  { %403 = vsyncadd [#allocation4], 4294966784 }
  0x80   :  { %404 = dma.done.wait [#allocation11], 512  }
  0x81   :  { %405 = vsyncadd [#allocation11], 4294966784 }
  0x82   :  { %272 = vsyncpa [#allocation3], 1 }
  0x83   :  { %273 = vsyncpa [#allocation4], 1 }
  0x84   :  { %274 = vsyncpa [#allocation11], 1 }
  0x85   :  { %275 = vsyncpa [#allocation5], 1 }
  0x86   :  { %276 = vsyncpa [#allocation7], 1 }

</bundles_post_ra>
